<compile_context>
chip_gen: v6e
topology: v6e:2x2x1
jax: 0.10.0
libtpu: 0.0.40
codegen_flags: <defaults>
</compile_context>

<pallas_src>
import jax
import jax.numpy as jnp
from jax import lax
from jax.experimental import pallas as pl
from jax.experimental.pallas import tpu as pltpu


_BN_EPS = 1e-5        # torch.nn.BatchNorm1d default eps
_NORM_EPS_SQ = 1e-24  # F.normalize eps=1e-12 on the norm  <=>  1e-24 on the squared norm


def _rsqrt1(v):
    """f32 rsqrt + one Newton step (EUP op + a few VPU ops; ~1 ulp vs 1/sqrt)."""
    r = lax.rsqrt(v)
    return r * (1.5 - 0.5 * v * r * r)


def _make_stage_kernel(*, bn_in, stats_out, final, n_true, tile_n, ragged, mm_dtype):
    """One pipeline stage over a [tile_n, d_in] slab of the batch.

      bn_in:     fold the previous layer's BatchNorm (from its raw batch stats) + ReLU
      stats_out: emit this tile's (sum ; sum-of-squares) of the new pre-activations
      final:     add the last Linear's bias and L2-normalize rows (phase-'1' output)
    """

    def kernel(*refs):
        idx = 0
        h_ref = refs[idx]; idx += 1
        if bn_in:
            stats_in_ref = refs[idx]; idx += 1
        w_ref = refs[idx]; idx += 1
        if final:
            b_ref = refs[idx]; idx += 1
        y_ref = refs[idx]; idx += 1
        stats_out_ref = refs[idx] if stats_out else None

        h = h_ref[...].astype(jnp.float32)

        if bn_in:
            # In-kernel stats combine + BN fold (gamma=1, beta=0): scale/shift are
            # (1, d_in) vectors; the redundant per-tile reduction is free filler.
            total = jnp.sum(stats_in_ref[...], axis=0)                # [2, d_in]
            mean = total[0:1, :] / n_true
            var = jnp.maximum(total[1:2, :] / n_true - mean * mean, 0.0)
            scale = _rsqrt1(var + _BN_EPS)
            shift = -mean * scale
            h = jnp.maximum(h * scale + shift, 0.0)                   # FMA + max

        # MXU matmul; operands in mm_dtype (bf16 on v6e/v7x), f32 accumulation.
        z = jnp.dot(h.astype(mm_dtype), w_ref[...],
                    preferred_element_type=jnp.float32)

        if stats_out:
            if ragged:
                # Mask rows past the true batch (last partial block reads garbage);
                # select (not multiply) so NaN/Inf garbage cannot leak into the sums.
                row = (pl.program_id(0) * tile_n
                       + lax.broadcasted_iota(jnp.int32, (tile_n, 1), 0))
                zm = jnp.where(row < n_true, z, 0.0)
            else:
                zm = z
            s1 = jnp.sum(zm, axis=0, keepdims=True)
            s2 = jnp.sum(zm * zm, axis=0, keepdims=True)
            stats_out_ref[...] = jnp.concatenate([s1, s2], axis=0)[None, :, :]

        if final:
            z = z + b_ref[...]
            # Row-wise L2 normalize: rsqrt of the clamped squared norm.
            ssq = jnp.sum(z * z, axis=1, keepdims=True)
            y_ref[...] = (z * _rsqrt1(jnp.maximum(ssq, _NORM_EPS_SQ))).astype(y_ref.dtype)
        else:
            y_ref[...] = z.astype(y_ref.dtype)       # bf16 store on the default path

    return kernel


def _stage_compiler_params(tile_n, d_in, d_out, in_bytes, out_bytes, n_tiles, mm_bytes):
    # Double-buffered streaming tiles + (conservatively double-buffered) resident
    # weights / stats / bias + headroom; clamped to the queried per-core VMEM
    # capacity minus an 8 MiB margin (v7x: 64 MiB total -> 56 MiB cap).
    stream = 2 * tile_n * (d_in * in_bytes + d_out * out_bytes)
    resident = 2 * (d_in * d_out * mm_bytes + n_tiles * 2 * d_in * 4
                    + 2 * d_out * 4 + d_out * 4)
    need = stream + resident + (4 << 20)
    try:
        cap = int(pltpu.get_tpu_info().vmem_capacity_bytes)
    except Exception:
        cap = 64 << 20                          # smallest per-core VMEM (v7x)
    cap = max(cap - (8 << 20), 32 << 20)
    return pltpu.CompilerParams(
        dimension_semantics=("parallel",),
        vmem_limit_bytes=int(min(max(need, 16 << 20), cap)))


def st_clustering_forward(x, params, *, tile_n=None, use_bf16_matmul=True):
    """STClustering.forward (phase '1').

    params: list of (W [in, out], b [1, out]) per encoder Linear, in order.
    Hidden-layer biases are accepted for API parity but never sent to the TPU:
    training-mode BatchNorm (gamma=1, beta=0) cancels them exactly.
    """
    n_layers = len(params)
    assert n_layers >= 1
    x = jnp.asarray(x, jnp.float32)
    n, _ = x.shape
    mm_dtype = jnp.bfloat16 if use_bf16_matmul else jnp.float32
    mm_bytes = jnp.dtype(mm_dtype).itemsize

    # Batch tiling: 'parallel' grid -> megacore / both v7x TensorCores. Large tiles
    # amortize the fixed per-grid-step overhead; VMEM stays nearly empty.
    if tile_n is None:
        tile_n = 8192
    if tile_n >= n:
        tile_n = n                               # single block == full row extent
    else:
        tile_n = max(16, (int(tile_n) // 16) * 16)   # sublane-safe for f32 and bf16
    n_tiles = -(-n // tile_n)
    ragged = (n % tile_n) != 0

    # Weights: drop hidden biases, pre-cast once to mm_dtype (tiny arrays).
    ws = [jnp.asarray(w, jnp.float32).astype(mm_dtype) for (w, _) in params]
    b_last = jnp.asarray(params[-1][1], jnp.float32).reshape(1, -1)

    h = x                                        # read f32 x directly; cast in-kernel
    stats = None
    for li in range(n_layers):
        w = ws[li]
        d_in, d_mid = w.shape
        is_final = li == n_layers - 1
        bn_in = li > 0

        kernel = _make_stage_kernel(
            bn_in=bn_in, stats_out=(not is_final), final=is_final,
            n_true=n, tile_n=tile_n, ragged=ragged, mm_dtype=mm_dtype)

        in_bytes = jnp.dtype(h.dtype).itemsize
        in_specs = [pl.BlockSpec((tile_n, d_in), lambda i: (i, 0))]
        inputs = [h]
        if bn_in:
            in_specs.append(pl.BlockSpec((n_tiles, 2, d_in), lambda i: (0, 0, 0)))
            inputs.append(stats)
        in_specs.append(pl.BlockSpec((d_in, d_mid), lambda i: (0, 0)))
        inputs.append(w)
        if is_final:
            in_specs.append(pl.BlockSpec((1, d_mid), lambda i: (0, 0)))
            inputs.append(b_last)

        if is_final:
            out_bytes = 4
            out_shape = jax.ShapeDtypeStruct((n, d_mid), jnp.float32)
            out_specs = pl.BlockSpec((tile_n, d_mid), lambda i: (i, 0))
        else:
            out_bytes = mm_bytes
            out_shape = (jax.ShapeDtypeStruct((n, d_mid), mm_dtype),
                         jax.ShapeDtypeStruct((n_tiles, 2, d_mid), jnp.float32))
            out_specs = (pl.BlockSpec((tile_n, d_mid), lambda i: (i, 0)),
                         pl.BlockSpec((1, 2, d_mid), lambda i: (i, 0, 0)))

        result = pl.pallas_call(
            kernel,
            grid=(n_tiles,),
            in_specs=in_specs,
            out_specs=out_specs,
            out_shape=out_shape,
            compiler_params=_stage_compiler_params(
                tile_n, d_in, d_mid, in_bytes, out_bytes, n_tiles, mm_bytes),
        )(*inputs)

        if is_final:
            return result
        h, stats = result


def init_params(dims, key):
    """xavier_uniform_ weights + PyTorch-default uniform bias, for the
    n_stacks-1 encoder Linear layers (dims[0] -> ... -> dims[-2])."""
    n_layers = len(dims) - 2
    params = []
    for i in range(n_layers):
        in_d, out_d = dims[i], dims[i + 1]
        key, kw, kb = jax.random.split(key, 3)
        bound_w = (6.0 / (in_d + out_d)) ** 0.5          # xavier uniform
        w = jax.random.uniform(kw, (in_d, out_d), jnp.float32, -bound_w, bound_w)
        bound_b = 1.0 / (in_d ** 0.5)                    # torch Linear default bias init
        b = jax.random.uniform(kb, (1, out_d), jnp.float32, -bound_b, bound_b)
        params.append((w, b))
    return params


def reference_forward(x, params):
    """Pure-JAX mirror of the PyTorch module (phase '1', training-mode BN).
    Keeps the hidden-layer bias adds and the two-pass variance so it also
    validates the kernel's algebraic simplifications."""
    h = jnp.asarray(x, jnp.float32)
    n_layers = len(params)
    for li, (w, b) in enumerate(params):
        h = h @ w + b
        if li < n_layers - 1:
            mean = jnp.mean(h, axis=0, keepdims=True)
            var = jnp.mean((h - mean) ** 2, axis=0, keepdims=True)
            h = (h - mean) / jnp.sqrt(var + _BN_EPS)
            h = jnp.maximum(h, 0.0)
    norm = jnp.sqrt(jnp.sum(h * h, axis=1, keepdims=True))
    return h / jnp.maximum(norm, 1e-12)


if __name__ == "__main__":
    # dims = [input_dim, hidden, latent_dim, n_clusters]; encoder is
    # Linear(64->32) + BN + ReLU + Linear(32->16); the clustering head (dims[-1])
    # is unused by forward() in phase '1'.
    dims = [64, 32, 16, 8]

    key = jax.random.PRNGKey(0)
    key, kx1, kx2, kp = jax.random.split(key, 4)
    params = init_params(dims, kp)

    # --- small demo batch (single block) ---
    x_small = jax.random.normal(kx1, (8, dims[0]), jnp.float32)
    ref_s = reference_forward(x_small, params)

    out_f32 = jax.block_until_ready(
        st_clustering_forward(x_small, params, use_bf16_matmul=False))
    assert out_f32.shape == (8, dims[-2])
    assert jnp.allclose(out_f32, ref_s, atol=2e-4, rtol=2e-4), "f32 mismatch (small batch)"

    out_bf16 = jax.block_until_ready(
        st_clustering_forward(x_small, params, use_bf16_matmul=True))
    assert float(jnp.max(jnp.abs(out_bf16 - ref_s))) < 5e-2, "bf16 mismatch (small batch)"

    # --- ragged multi-tile batch (200 rows, tile 64): exercises partial-block
    #     masking, masked batch stats and the 'parallel' N grid ---
    x_big = jax.random.normal(kx2, (200, dims[0]), jnp.float32)
    ref_b = reference_forward(x_big, params)

    out_big = jax.block_until_ready(
        st_clustering_forward(x_big, params, tile_n=64, use_bf16_matmul=False))
    assert out_big.shape == (200, dims[-2])
    assert jnp.allclose(out_big, ref_b, atol=2e-4, rtol=2e-4), "f32 mismatch (multi-tile)"

    out_big_bf16 = jax.block_until_ready(
        st_clustering_forward(x_big, params, tile_n=64, use_bf16_matmul=True))
    assert float(jnp.max(jnp.abs(out_big_bf16 - ref_b))) < 5e-2, "bf16 mismatch (multi-tile)"

    # --- default tiling: whole batch in one block per stage ---
    out_big_default = jax.block_until_ready(
        st_clustering_forward(x_big, params, use_bf16_matmul=False))
    assert jnp.allclose(out_big_default, ref_b, atol=2e-4, rtol=2e-4), \
        "f32 mismatch (default tile)"

    print("KERNEL_OK")
</pallas_src>

<mosaic_0001>
module attributes {stable_mosaic.version = 11 : i64} {
  func.func @kernel(%arg0: i32, %arg1: memref<8x64xf32, #tpu.memory_space<vmem>>, %arg2: memref<64x32xf32, #tpu.memory_space<vmem>>, %arg3: memref<8x32xf32, #tpu.memory_space<vmem>>, %arg4: memref<1x2x32xf32, #tpu.memory_space<vmem>>) attributes {dimension_semantics = [#tpu.dimension_semantics<parallel>], iteration_bounds = array<i64: 1>, scalar_prefetch = 0 : i64, scratch_operands = 0 : i64, tpu.core_type = #tpu.core_type<tc>, window_params = [{transform_indices = @transform_0, window_bounds = array<i64: 8, 64>}, {pipeline_mode = #tpu.pipeline_mode<synchronous>, transform_indices = @transform_1, window_bounds = array<i64: 64, 32>}, {transform_indices = @transform_2, window_bounds = array<i64: 8, 32>}, {transform_indices = @transform_3, window_bounds = array<i64: 1, 2, 32>}]} {
    %c0 = arith.constant 0 : index
    %c0_0 = arith.constant 0 : index
    %0 = vector.load %arg1[%c0, %c0_0] : memref<8x64xf32, #tpu.memory_space<vmem>>, vector<8x64xf32>
    %c0_1 = arith.constant 0 : index
    %c0_2 = arith.constant 0 : index
    %1 = vector.load %arg2[%c0_1, %c0_2] : memref<64x32xf32, #tpu.memory_space<vmem>>, vector<64x32xf32>
    %cst = arith.constant dense<0.000000e+00> : vector<8x32xf32>
    %2 = tpu.matmul %0, %1, %cst {dimension_numbers = #tpu.dot_dimension_numbers<[1], [0], [0], [1], [0, 0, 1, 1], [], []>} : vector<8x64xf32>, vector<64x32xf32>, vector<8x32xf32> -> vector<8x32xf32>
    %cst_3 = arith.constant dense<0.000000e+00> : vector<32xf32>
    %3 = vector.multi_reduction <add>, %2, %cst_3 [0] : vector<8x32xf32> to vector<32xf32>
    %4 = vector.shape_cast %3 : vector<32xf32> to vector<1x32xf32>
    %5 = arith.mulf %2, %2 : vector<8x32xf32>
    %cst_4 = arith.constant dense<0.000000e+00> : vector<32xf32>
    %6 = vector.multi_reduction <add>, %5, %cst_4 [0] : vector<8x32xf32> to vector<32xf32>
    %7 = vector.shape_cast %6 : vector<32xf32> to vector<1x32xf32>
    %8 = tpu.concatenate %4, %7 in 0 : vector<1x32xf32>, vector<1x32xf32> -> vector<2x32xf32>
    %9 = vector.shape_cast %8 : vector<2x32xf32> to vector<1x2x32xf32>
    %c0_5 = arith.constant 0 : index
    %c0_6 = arith.constant 0 : index
    %c0_7 = arith.constant 0 : index
    %10 = vector.load %arg4[%c0_5, %c0_6, %c0_7] : memref<1x2x32xf32, #tpu.memory_space<vmem>>, vector<1x2x32xf32>
    tpu.vector_store %arg4[%c0_5, %c0_6, %c0_7], %9 {strides = array<i32>} : memref<1x2x32xf32, #tpu.memory_space<vmem>>, vector<1x2x32xf32>,
    %c0_8 = arith.constant 0 : index
    %c0_9 = arith.constant 0 : index
    %11 = vector.load %arg3[%c0_8, %c0_9] : memref<8x32xf32, #tpu.memory_space<vmem>>, vector<8x32xf32>
    tpu.vector_store %arg3[%c0_8, %c0_9], %2 {strides = array<i32>} : memref<8x32xf32, #tpu.memory_space<vmem>>, vector<8x32xf32>,
    return
  }
  func.func @transform_0(%arg0: i32) -> (i32, i32) {
    %c0_i32 = arith.constant 0 : i32
    %c0_i32_0 = arith.constant 0 : i32
    return %arg0, %c0_i32 : i32, i32
  }
  func.func @transform_1(%arg0: i32) -> (i32, i32) {
    %c0_i32 = arith.constant 0 : i32
    %c0_i32_0 = arith.constant 0 : i32
    %c0_i32_1 = arith.constant 0 : i32
    return %c0_i32, %c0_i32_0 : i32, i32
  }
  func.func @transform_2(%arg0: i32) -> (i32, i32) {
    %c0_i32 = arith.constant 0 : i32
    %c0_i32_0 = arith.constant 0 : i32
    return %arg0, %c0_i32 : i32, i32
  }
  func.func @transform_3(%arg0: i32) -> (i32, i32, i32) {
    %c0_i32 = arith.constant 0 : i32
    %c0_i32_0 = arith.constant 0 : i32
    %c0_i32_1 = arith.constant 0 : i32
    return %arg0, %c0_i32, %c0_i32_0 : i32, i32, i32
  }
}

</mosaic_0001>

<bundles_post_ra>
// kernel: tpu_custom_call.1
= control target key start
LH: loop header
LB: loop body
LE: loop exit
PB: predicated region body
PF: predicated region fallthrough
CT: control target
= control target key end

     0   :  { %9 = vsyncpa [#allocation3], 0  ;;  %v224_v1 = vmov 0.0   ;;  %vm225_vm0 = vmmov 0   ;;  %s284_s0 = inlined_call_operand.vmem [shape: f32[8,64], index: 0, kind: input, shape index: {}]   ;;  %s285_s1 = inlined_call_operand.vmem [shape: f32[64,32], index: 1, kind: input, shape index: {}]   ;;  %s286_s2 = inlined_call_operand.hbm [shape: f32[8,32], index: 2, kind: output, shape index: {0}]   ;;  %s287_s3 = inlined_call_operand.hbm [shape: f32[1,2,32], index: 3, kind: output, shape index: {1}]  }
   0x1   :  { %v23_v0 = vld [vmem:[%s285_s1 + $0x38] sm:$0xff]  ;;  %157 = vmatprep.subr.mxu0 %v224_v1  ;;  %v22_v2 = vld [vmem:[%s285_s1 + $0x30] sm:$0xff]  ;;  %173 = vmatprep.mubr.msk.f32.mxu0 %vm225_vm0, %v224_v1  ;;  %v21_v3 = vld [vmem:[%s285_s1 + $0x28] sm:$0xff] }
   0x2   :  { %158 = vmatpush3.msra.mxu0 %v23_v0 }
   0x3   :  { %159 = vmatprep.subr.mxu0 %v224_v1 }
   0x4   :  { %10 = vsyncpa [#allocation5], 0  ;;  %160 = vmatpush3.msra.mxu0 %v22_v2  ;;  %v20_v4 = vld [vmem:[%s285_s1 + $0x20] sm:$0xff]  ;;  %v19_v5 = vld [vmem:[%s285_s1 + $0x18] sm:$0xff]  ;;  %vm24_vm1 = vcmask 523264   ;;  %s226_s30 = smov [#allocation2]  }
   0x5   :  { %161 = vmatprep.subr.mxu0 %v224_v1  ;;  %v18_v6 = vld [vmem:[%s285_s1 + $0x10] sm:$0xff]  ;;  %v17_v7 = vld [vmem:[%s285_s1 + $0x8] sm:$0xff]  ;;  %v16_v8 = vld [vmem:[%s285_s1] sm:$0xff]  ;;  %s125_s4 = sshll.u32 %s226_s30, 4  ;;  %vm98_vm2 = vcmask 261120   ;;  %s126_s4 = int_to_ptr.vmem [resolvable:$true] %s125_s4 }
   0x6   :  { %162 = vmatpush3.msra.mxu0 %v21_v3  ;;  %v15_v9 = vld [vmem:[%s284_s0] sm:$0xff]  ;;  %s180_s1 = scalar_lea.vmem %s126_s4, 128  ;;  %p185_p1 = scmp.lt.s32.totalorder %s126_s4, %s126_s4 }
   0x7   :  { %163 = vmatprep.subr.mxu0 %v224_v1  ;;  %p181_p0 = scmp.ne.s32.totalorder %s126_s4, %s180_s1  ;;  %p186_p2 = scmp.lt.s32.totalorder %s180_s1, %s180_s1 }
   0x8   :  { %164 = vmatpush3.msra.mxu0 %v20_v4 }
   0x9   :  { %165 = vmatprep.subr.mxu0 %v224_v1  ;;  %p187_p3 = por %p186_p2, %p185_p1 }
   0xa   :  { %166 = vmatpush3.msra.mxu0 %v19_v5 }
   0xb   :  { %167 = vmatprep.subr.mxu0 %v224_v1  ;;  %p188_p4 = pnand %p187_p3, %p181_p0 }
   0xc   :  { %168 = vmatpush3.msra.mxu0 %v18_v6 }
   0xd   :  { %169 = vmatprep.subr.mxu0 %v224_v1 }
   0xe   :  { %170 = vmatpush3.msra.mxu0 %v17_v7 }
   0xf   :  { %171 = vmatprep.subr.mxu0 %v224_v1 }
  0x10   :  { %172 = vmatpush3.msra.mxu0 %v16_v8 }
  0x11   :  { %174 = vmatmul.mubr.msk.f32.vlgmr.msra.gmra.mxu0 %vm24_vm1, %v15_v9 }
  0xd1   :  { %v94_v10 = vpop.f32.mrf.mxu0 }
  0xd2   :  { %v106_v11 = vmul.f32 %v94_v10, %v94_v10  ;;  %v99_v12 = vsel %vm98_vm2, %v94_v10, 0.0  ;;  %118 = vst.msk [vmem:[#allocation2] sm:$0xff] %vm98_vm2, %v94_v10 }
  0xd3   :  { %v175_v13 = vpop.f32.mrf.mxu0  ;;  %v100_v14 = vrot.slane %v99_v12, 4 }
  0xd4   :  { %191 = shalt.err (!%p188_p4)
}
  0xd5   :  { %128 = dma.vmem_to_hbm [thread:$0]  %s126_s4, 128, %s286_s2, [#allocation3]   ;;  %v107_v15 = vsel %vm98_vm2, %v106_v11, 0.0  ;;  %v101_v16 = vadd.f32 %v100_v14, %v99_v12  ;;  %vm114_vm3 = vcmask 1040384   ;;  %vm116_vm4 = vcmask 254976  }
  0xd6   :  { %v108_v17 = vrot.slane %v107_v15, 4  ;;  %s227_s6 = smov [#allocation4]  }
  0xd7   :  { %v102_v18 = vrot.slane %v101_v16, 2  ;;  %s135_s7 = sshll.u32 %s227_s6, 4  ;;  %s136_s7 = int_to_ptr.vmem [resolvable:$true] %s135_s7 }
  0xd8   :  { %v109_v19 = vadd.f32 %v108_v17, %v107_v15  ;;  %s200_s2 = scalar_lea.vmem %s136_s7, 32  ;;  %p205_p6 = scmp.lt.s32.totalorder %s136_s7, %s136_s7 }
  0xd9   :  { %v103_v20 = vadd.f32 %v102_v18, %v101_v16  ;;  %p201_p5 = scmp.ne.s32.totalorder %s136_s7, %s200_s2  ;;  %p206_p7 = scmp.lt.s32.totalorder %s200_s2, %s200_s2 }
  0xda   :  { %v110_v21 = vrot.slane %v109_v19, 2 }
  0xdb   :  { %v104_v23 = vrot.slane %v103_v20, 1  ;;  %p207_p8 = por %p206_p7, %p205_p6 }
  0xdc   :  { %v111_v22 = vadd.f32 %v110_v21, %v109_v19 }
  0xdd   :  { %v105_v25 = vadd.f32 %v104_v23, %v103_v20  ;;  %p208_p9 = pnand %p207_p8, %p201_p5 }
  0xde   :  { %v112_v24 = vrot.slane %v111_v22, 1 }
  0xe0   :  { %v113_v26 = vadd.f32 %v112_v24, %v111_v22 }
  0xe2   :  { %v115_v27 = vsel %vm114_vm3, %v105_v25, %v113_v26 }
  0xe3   :  { %117 = vst.msk [vmem:[#allocation4] sm:$0x3] %vm116_vm4, %v115_v27 }
  0xe4   :  { %211 = shalt.err (!%p208_p9)
}
  0xe5   :  { %138 = dma.vmem_to_hbm [thread:$0]  %s136_s7, 32, %s287_s3, [#allocation5]  }
  0xe6   :  { %220 = dma.done.wait [#allocation3], 128  }
  0xe7   :  { %221 = vsyncadd [#allocation3], 4294967168 }
  0xe8   :  { %222 = dma.done.wait [#allocation5], 32  }
  0xe9   :  { %223 = vsyncadd [#allocation5], 4294967264 }
  0xea   :  { %145 = vsyncpa [#allocation3], 1 }
  0xeb   :  { %146 = vsyncpa [#allocation5], 1 }

</bundles_post_ra>
